<compile_context>
chip_gen: v6e
topology: v6e:2x2x1
jax: 0.10.0
libtpu: 0.0.40
codegen_flags: <defaults>
</compile_context>

<pallas_src>
import jax
import jax.numpy as jnp
from jax.experimental import pallas as pl
from jax.experimental.pallas import tpu as pltpu


def critic_kernel(p_ref, x_ref, o_ref):
    # p_ref: (5,) f32 in SMEM = [w0, w1, w2, w3, b]   (fused affine params)
    # x_ref: (4, TB) in VMEM   (features on sublanes, batch on lanes)
    # o_ref: (1, TB) f32 in VMEM (lane-dense Q-values)
    x = x_ref[...].astype(jnp.float32)
    q = (p_ref[0] * x[0:1, :]
         + p_ref[1] * x[1:2, :]
         + p_ref[2] * x[2:3, :]
         + p_ref[3] * x[3:4, :]
         + p_ref[4])
    o_ref[...] = q.astype(o_ref.dtype)


def _round_up(n, m):
    return ((n + m - 1) // m) * m


def _fuse_params(w1, b1, w2, b2):
    # Eval-mode dropout is identity and there is no nonlinearity, so the two
    # affine layers fold into one.
    wf = (w1 @ w2).reshape(-1)                       # (4,)
    bf = (b1 @ w2 + b2).reshape(-1)                  # (1,)
    return jnp.concatenate([wf, bf]).astype(jnp.float32)   # (5,)


def critic_forward_fm(x_fm, w1, b1, w2, b2, *, tb=None):
    """Features-major entry point: x_fm (4, B) -> q (B, 1).

    No HBM transpose, no jnp.pad — this is the recommended path for large
    rollout batches whose buffer is stored features-major.
    """
    B = x_fm.shape[1]                                # static Python int assumed
    params = _fuse_params(w1, b1, w2, b2)

    if tb is None:
        # Aim for ~8 grid steps (keeps the DMA pipeline busy and shards the
        # parallel axis over both v7x TensorCores) while capping blocks at
        # 64K lanes: at tb=64K the footprint is ~6 MiB
        # (2 x 1 MiB input buffers + 2 x 2 MiB sublane-padded (1, tb) output
        # buffers), comfortably under v5e's 16 MiB default scoped-VMEM limit.
        tb = _round_up(pl.cdiv(B, 8), 128)
        tb = max(128, min(tb, 64 * 1024))
    else:
        tb = max(128, _round_up(int(tb), 128))

    grid = pl.cdiv(B, tb)  # partial last block handled by Pallas (writes masked)

    out = pl.pallas_call(
        critic_kernel,
        out_shape=jax.ShapeDtypeStruct((1, B), jnp.float32),
        grid=(grid,),
        in_specs=[
            pl.BlockSpec(memory_space=pltpu.MemorySpace.SMEM),   # packed params
            pl.BlockSpec((4, tb), lambda i: (0, i)),             # x tile
        ],
        out_specs=pl.BlockSpec((1, tb), lambda i: (0, i)),
        compiler_params=pltpu.CompilerParams(
            dimension_semantics=("parallel",)),                  # v7x megacore
    )(params, x_fm)

    return out.T                                     # (B, 1)


def critic_forward(x, w1, b1, w2, b2, *, tb=None, min_pallas_batch=2048):
    """Batch-major convenience entry: x (B, 4) -> q (B, 1).

    Tiny batches (online control steps) skip the Pallas call entirely — a
    fused XLA dot beats the custom-call + pad-to-128 overhead.  Large batches
    pay one transpose to features-major; callers whose rollout buffer already
    stores (4, B) should call critic_forward_fm directly to avoid that pass.
    """
    B = x.shape[0]
    params = _fuse_params(w1, b1, w2, b2)
    if B < min_pallas_batch:
        return x.astype(jnp.float32) @ params[:4].reshape(4, 1) + params[4]
    return critic_forward_fm(x.T, w1, b1, w2, b2, tb=tb)


def init_params(key):
    """Deterministic init mimicking torch.nn.Linear default (uniform +-1/sqrt(fan_in))."""
    k1, k2, k3, k4 = jax.random.split(key, 4)
    bound1 = 1.0 / jnp.sqrt(4.0)
    bound2 = 1.0 / jnp.sqrt(32.0)
    # Stored as (in_features, out_features) so the math is x @ W + b.
    w1 = jax.random.uniform(k1, (4, 32), jnp.float32, -bound1, bound1)
    b1 = jax.random.uniform(k2, (1, 32), jnp.float32, -bound1, bound1)
    w2 = jax.random.uniform(k3, (32, 1), jnp.float32, -bound2, bound2)
    b2 = jax.random.uniform(k4, (1, 1), jnp.float32, -bound2, bound2)
    return w1, b1, w2, b2


def reference_forward(x, w1, b1, w2, b2):
    h = x @ w1 + b1          # Linear(4, 32)
    # Dropout(0.5) in eval mode == identity.
    return h @ w2 + b2       # Linear(32, 1)


if __name__ == "__main__":
    key = jax.random.PRNGKey(0)
    k_x, k_p = jax.random.split(key)
    w1, b1, w2, b2 = init_params(k_p)

    # 1) Tiny online-control batch: exercises the small-batch short-circuit.
    x_small = jax.random.normal(k_x, (8, 4), jnp.float32)
    out_small = jax.block_until_ready(critic_forward(x_small, w1, b1, w2, b2))
    ref_small = reference_forward(x_small, w1, b1, w2, b2)
    assert out_small.shape == (8, 1)
    assert jnp.allclose(out_small, ref_small, atol=1e-4, rtol=1e-4)

    # 2) Features-major "rollout buffer" batch with B not a multiple of 128 and
    #    a small forced tile -> multi-step grid + partial last block through the
    #    Pallas path (no wrapper transpose, no wrapper pad).
    B = 300
    x_fm = jax.random.normal(k_x, (4, B), jnp.float32)   # rollout-buffer layout
    out = jax.block_until_ready(critic_forward_fm(x_fm, w1, b1, w2, b2, tb=128))
    ref = reference_forward(x_fm.T, w1, b1, w2, b2)
    assert out.shape == (B, 1)
    assert jnp.allclose(out, ref, atol=1e-4, rtol=1e-4)

    print("KERNEL_OK")
</pallas_src>

<mosaic_0001>
module attributes {stable_mosaic.version = 11 : i64} {
  func.func @critic_kernel(%arg0: i32, %arg1: memref<5xf32, #tpu.memory_space<smem>>, %arg2: memref<4x128xf32, #tpu.memory_space<vmem>>, %arg3: memref<1x128xf32, #tpu.memory_space<vmem>>) attributes {dimension_semantics = [#tpu.dimension_semantics<parallel>], iteration_bounds = array<i64: 3>, scalar_prefetch = 0 : i64, scratch_operands = 0 : i64, tpu.core_type = #tpu.core_type<tc>, window_params = [{transform_indices = @transform_0, window_bounds = array<i64: 5>}, {transform_indices = @transform_1, window_bounds = array<i64: 4, 128>}, {transform_indices = @transform_2, window_bounds = array<i64: 1, 128>}]} {
    %c0 = arith.constant 0 : index
    %c0_0 = arith.constant 0 : index
    %0 = vector.load %arg2[%c0, %c0_0] : memref<4x128xf32, #tpu.memory_space<vmem>>, vector<4x128xf32>
    %c0_1 = arith.constant 0 : index
    %1 = memref.load %arg1[%c0_1] : memref<5xf32, #tpu.memory_space<smem>>
    %2 = vector.extract_strided_slice %0 {offsets = [0, 0], sizes = [1, 128], strides = [1, 1]} : vector<4x128xf32> to vector<1x128xf32>
    %3 = vector.broadcast %1 : f32 to vector<1x128xf32>
    %4 = arith.mulf %3, %2 : vector<1x128xf32>
    %c1 = arith.constant 1 : index
    %5 = memref.load %arg1[%c1] : memref<5xf32, #tpu.memory_space<smem>>
    %6 = vector.extract_strided_slice %0 {offsets = [1, 0], sizes = [1, 128], strides = [1, 1]} : vector<4x128xf32> to vector<1x128xf32>
    %7 = vector.broadcast %5 : f32 to vector<1x128xf32>
    %8 = arith.mulf %7, %6 : vector<1x128xf32>
    %9 = arith.addf %4, %8 : vector<1x128xf32>
    %c2 = arith.constant 2 : index
    %10 = memref.load %arg1[%c2] : memref<5xf32, #tpu.memory_space<smem>>
    %11 = vector.extract_strided_slice %0 {offsets = [2, 0], sizes = [1, 128], strides = [1, 1]} : vector<4x128xf32> to vector<1x128xf32>
    %12 = vector.broadcast %10 : f32 to vector<1x128xf32>
    %13 = arith.mulf %12, %11 : vector<1x128xf32>
    %14 = arith.addf %9, %13 : vector<1x128xf32>
    %c3 = arith.constant 3 : index
    %15 = memref.load %arg1[%c3] : memref<5xf32, #tpu.memory_space<smem>>
    %16 = vector.extract_strided_slice %0 {offsets = [3, 0], sizes = [1, 128], strides = [1, 1]} : vector<4x128xf32> to vector<1x128xf32>
    %17 = vector.broadcast %15 : f32 to vector<1x128xf32>
    %18 = arith.mulf %17, %16 : vector<1x128xf32>
    %19 = arith.addf %14, %18 : vector<1x128xf32>
    %c4 = arith.constant 4 : index
    %20 = memref.load %arg1[%c4] : memref<5xf32, #tpu.memory_space<smem>>
    %21 = vector.broadcast %20 : f32 to vector<1x128xf32>
    %22 = arith.addf %19, %21 : vector<1x128xf32>
    %c0_2 = arith.constant 0 : index
    %c0_3 = arith.constant 0 : index
    %23 = vector.load %arg3[%c0_2, %c0_3] : memref<1x128xf32, #tpu.memory_space<vmem>>, vector<1x128xf32>
    tpu.vector_store %arg3[%c0_2, %c0_3], %22 {strides = array<i32>} : memref<1x128xf32, #tpu.memory_space<vmem>>, vector<1x128xf32>,
    return
  }
  func.func @transform_0(%arg0: i32) -> i32 {
    %c0_i32 = arith.constant 0 : i32
    %c0_i32_0 = arith.constant 0 : i32
    return %c0_i32 : i32
  }
  func.func @transform_1(%arg0: i32) -> (i32, i32) {
    %c0_i32 = arith.constant 0 : i32
    %c0_i32_0 = arith.constant 0 : i32
    return %c0_i32, %arg0 : i32, i32
  }
  func.func @transform_2(%arg0: i32) -> (i32, i32) {
    %c0_i32 = arith.constant 0 : i32
    %c0_i32_0 = arith.constant 0 : i32
    return %c0_i32, %arg0 : i32, i32
  }
}

</mosaic_0001>

<bundles_post_ra>
// kernel: tpu_custom_call.1
= control target key start
LH: loop header
LB: loop body
LE: loop exit
PB: predicated region body
PF: predicated region fallthrough
CT: control target
= control target key end

     0   :  { %7 = vsyncpa [#allocation5], 0  ;;  %s641_s0 = inlined_call_operand.hbm [shape: f32[5], index: 0, kind: input, shape index: {}]   ;;  %s642_s1 = inlined_call_operand.hbm [shape: f32[4,300], index: 1, kind: input, shape index: {}]   ;;  %s643_s2 = inlined_call_operand.hbm [shape: f32[1,300], index: 2, kind: output, shape index: {}]  }
   0x1   :  { %8 = vsyncpa [#allocation3], 0 }
   0x2   :  { %10 = vsyncpa [#allocation3 + $0x1], 0 }
   0x3   :  { %11 = vsyncpa [#allocation4], 0 }
   0x4   :  { %13 = vsyncpa [#allocation4 + $0x1], 0  ;;  %s490_s9 = smov 0   ;;  %s492_s10 = smov 0  }
   0x5   :  { %s494_s11 = smov 0   ;;  %s496_s12 = smov 0  }
   0x6 LB: > { %s511_s13 = sadd.s32 4294967295, %s470_s12   ;;  %s290_s14 = sadd.s32 4294967294, %s470_s12   ;;  %s470_s12 = sphi %s496_s12, %s662_s12   ;;  %s466_s11 = sphi %s494_s11, %s661_s11   ;;  %s462_s10 = sphi %s492_s10, %s660_s10   ;;  %s458_s9 = sphi %s490_s9, %s659_s9  }
   0x7   : > { %p60_p0 = scmp.ne.s32.totalorder %s462_s10, %s458_s9  ;;  %p644_p1 = scmp.eq.s32.totalorder %s511_s13, 0 }
   0x8   : > { %p84_p2 = scmp.eq.s32.totalorder %s511_s13, 2  ;;  %p90_p3 = scmp.eq.s32.totalorder %s290_s14, 2 }
   0x9   : > { %p520_p4 = por %p644_p1, %p60_p0  ;;  %p291_p5 = scmp.ge.s32.totalorder %s470_s12, 1 }
   0xa   : > { %p525_p6 = por %p90_p3, %p60_p0  ;;  %p97_p7 = scmp.lt.s32.totalorder %s470_s12, 4 }
   0xb   : > { %s648_s15 = scalar_select %p520_p4, 1, 0 }
   0xc   : > { %s649_s16 = scalar_select %p525_p6, 1, 0 }
   0xd   : > { %p530_p8 = pnand %p291_p5, %p97_p7  ;;  %s535_s18 = sadd.s32 1, %s470_s12  }
   0xe   : > { %s44_s19 = ssub.s32 %s470_s12, %s535_s18  ;;  %s47_s20 = sadd.s32 1, %s466_s11 }
   0xf   : > { %s650_s17 = scalar_select %p530_p8, 1, 0 }
  0x10   : > { %p314_p9 = pneg %p530_p8  ;;  %p45_p11 = scmp.eq.s32.totalorder %s44_s19, 0 }
  0x11   : > { %p54_p12 = scmp.ne.s32.totalorder %s466_s11, %s462_s10  ;;  %p55_p13 = scmp.eq.s32.totalorder %s470_s12, 0 }
  0x12   : > { %p315_p10 = pnand %p314_p9, %p644_p1  ;;  %p327_p0 = scmp.lt.s32.totalorder %s470_s12, 3 }
  0x13   : > { %s472_s21 = smov [#allocation2]   ;;  %p56_p3 = por %p55_p13, %p54_p12 }
  0x14   : > { %317 = dma.hbm_to_smem (!%p315_p10), %s641_s0, 16, %s472_s21, [#allocation5]  }
  0x15   : > { %s552_s24 = scalar_select %p45_p11, %s466_s11, %s47_s20  }
  0x16   : > { %p556_p5 = por %p84_p2, %p54_p12  ;;  %s119_s26 = sand.u32 1, %s466_s11  }
  0x17   : > { %s295_s27 = sshll.u32 %s470_s12, 6  ;;  %s294_s28 = sshll.u32 %s119_s26, 2 }
  0x18   : > { %s651_s25 = scalar_select %p556_p5, 1, 0 }
  0x19   : > { %s565_s3 = scalar_lea.hbm %s642_s1, %s295_s27  ;;  %s123_s4 = scalar_lea.vmem [#allocation6], %s294_s28 }
  0x1a   : > { %s130_s5 = sshll.u32 %s123_s4, 4  ;;  %p567_p7 = pnand %p327_p0, %p56_p3  ;;  %s131_s5 = int_to_ptr.vmem [resolvable:$true] %s130_s5 }
  0x1b   : > { %s120_s7 = scalar_lea.sflag [#allocation3], %s119_s26  ;;  %s374_s8 = scalar_lea.hbm %s565_s3, 64 }
  0x1c   : > { %p375_p2 = scmp.ne.s32.totalorder %s565_s3, %s374_s8  ;;  %p376_p9 = pneg %p567_p7 }
  0x1d   : > { %s379_s20 = scalar_lea.hbm %s642_s1, 192  ;;  %p380_p12 = scmp.lt.s32.totalorder %s565_s3, %s642_s1 }
  0x1e   : > { %p377_p10 = pnand %p376_p9, %p375_p2  ;;  %p381_p13 = scmp.lt.s32.totalorder %s379_s20, %s374_s8 }
  0x20   : > { %p378_p11 = pneg %p377_p10  ;;  %p382_p0 = por %p381_p13, %p380_p12 }
  0x22   : > { %p383_p3 = pnand %p382_p0, %p378_p11 }
  0x24   : > { %386 = shalt.err (!%p383_p3)
}
  0x25   : > { %s387_s23 = scalar_lea.vmem %s131_s5, 64  ;;  %s473_s26 = smov [#allocation6]  }
  0x26   : > { %p388_p1 = scmp.ne.s32.totalorder %s131_s5, %s387_s23  ;;  %s392_s27 = sshll.u32 %s473_s26, 4  ;;  %s393_s27 = int_to_ptr.vmem [resolvable:$false] %s392_s27 }
  0x27   : > { %s394_s28 = scalar_lea.vmem %s393_s27, 128  ;;  %p395_p2 = scmp.lt.s32.totalorder %s131_s5, %s393_s27 }
  0x28   : > { %p390_p6 = pnand %p388_p1, %p376_p9  ;;  %p396_p10 = scmp.lt.s32.totalorder %s394_s28, %s387_s23 }
  0x2a   : > { %p391_p5 = pneg %p390_p6  ;;  %p397_p4 = por %p396_p10, %p395_p2 }
  0x2c   : > { %p398_p8 = pnand %p397_p4, %p391_p5 }
  0x2e   : > { %401 = shalt.err (!%p398_p8)
}
  0x2f   : > { %321 = dma.hbm_to_vmem [thread:$0]  (!%p567_p7), %s565_s3, 64, %s131_s5, %s120_s7  }
  0x30   : > { %p653_p11 = scmp.ne.s32.totalorder %s650_s17, 0 }
  0x31   : > { %p654_p12 = scmp.eq.s32.totalorder (!%p653_p11), %s511_s13, 0 }
  0x32   : > { %139 = sbr.rel (%p653_p11) target bundleno = 95 (0x5f), region = 28 }
  0x37   : > { %445 = dma.done.wait (%p654_p12), [#allocation5], 16   ;;  %p655_p1 = pmov %p654_p12 }
  0x38   : > { %s592_s29 = sand.u32 1, %s462_s10   ;;  %p656_p4 = scmp.ne.s32.totalorder %s648_s15, 0 }
  0x39   : > { %447 = vsyncadd (%p655_p1), [#allocation5], 4294967280  ;;  %s298_s30 = sshll.u32 %s592_s29, 2  ;;  %s146_s4 = scalar_lea.sflag [#allocation3], %s592_s29 }
  0x3a   : > { %s149_s6 = scalar_lea.vmem [#allocation6], %s298_s30 }
  0x3b   : > { %449 = dma.done.wait (%p656_p4), %s146_s4, 64  }
  0x3c   : > { %451 = vsyncadd (%p656_p4), %s146_s4, 4294967232 }
  0x3d   : > { %154 = sfence }
  0x3e   : > { %s171_s17 = sld [smem:[#allocation2]]  ;;  %v170_v0 = vld [vmem:[%s149_s6] sm:$0xf]  ;;  %s169_s15 = scalar_lea.vmem [#allocation7], %s592_s29 }
  0x3f   : > { %s299_s3 = sld [smem:[#allocation2 + $0x1]]  ;;  %s212_s14 = sshll.u32 %s169_s15, 4  ;;  %s602_s14 = int_to_ptr.vmem [resolvable:$true] %s212_s14 }
  0x40   : > { %s300_s5 = sld [smem:[#allocation2 + $0x2]]  ;;  %s303_s19 = sshll.u32 %s511_s13, 4 }
  0x41   : > { %s301_s7 = sld [smem:[#allocation2 + $0x3]]  ;;  %s210_s22 = scalar_lea.hbm %s643_s2, %s303_s19 }
  0x42   : > { %s302_s8 = sld [smem:[#allocation2 + $0x4]]  ;;  %s200_s23 = scalar_lea.sflag [#allocation4], %s592_s29 }
  0x43   : > { %s402_s26 = scalar_lea.vmem %s602_s14, 16  ;;  %p657_p8 = scmp.ne.s32.totalorder %s651_s25, 0 }
  0x44   : > { %v172_v1 = vstv %s171_s17  ;;  %p403_p6 = scmp.ne.s32.totalorder %s602_s14, %s402_s26  ;;  %s474_s27 = smov [#allocation7]  }
  0x45   : > { %v175_v2 = vstv %s299_s3  ;;  %v173_v3 = vmul.f32 %v172_v1, %v170_v0  ;;  %s406_s13 = sshll.u32 %s474_s27, 4  ;;  %s407_s13 = int_to_ptr.vmem [resolvable:$false] %s406_s13 }
  0x46   : > { %v176_v4 = vmul.f32 %v175_v2, %v170_v0  ;;  %v182_v5 = vstv %s300_s5  ;;  %p404_p5 = pnand %p403_p6, %p657_p8  ;;  %s408_s28 = scalar_lea.vmem %s407_s13, 32 }
  0x47   : > { %v183_v6 = vmul.f32 %v182_v5, %v170_v0  ;;  %v189_v7 = vstv %s301_s7  ;;  %p409_p9 = scmp.lt.s32.totalorder %s602_s14, %s407_s13  ;;  %p410_p13 = scmp.lt.s32.totalorder %s408_s28, %s402_s26 }
  0x48   : > { %v178_v8 = vrot.slane %v176_v4, 1  ;;  %v190_v9 = vmul.f32 %v189_v7, %v170_v0  ;;  %v196_v14 = vstv %s302_s8  ;;  %p405_p7 = pneg %p404_p5 }
  0x49   : > { %v185_v10 = vrot.slane %v183_v6, 2  ;;  %p411_p0 = por %p410_p13, %p409_p9 }
  0x4a   : > { %v180_v11 = vadd.f32 %v178_v8, %v173_v3  ;;  %v192_v12 = vrot.slane %v190_v9, 3 }
  0x4b   : > { %p412_p3 = pnand %p411_p0, %p405_p7 }
  0x4c   : > { %v187_v13 = vadd.f32 %v185_v10, %v180_v11 }
  0x4e   : > { %v194_v15 = vadd.f32 %v192_v12, %v187_v13 }
  0x50   : > { %v197_v16 = vadd.f32 %v196_v14, %v194_v15 }
  0x52   : > { %198 = vst [vmem:[%s169_s15] sm:$0x1] %v197_v16 }
  0x53   : > { %415 = shalt.err (!%p412_p3)
}
  0x54   : > { %s416_s30 = scalar_lea.hbm %s210_s22, 16  ;;  %s420_s6 = scalar_lea.hbm %s643_s2, 48 }
  0x55   : > { %p417_p2 = scmp.ne.s32.totalorder %s210_s22, %s416_s30  ;;  %p421_p12 = scmp.lt.s32.totalorder %s210_s22, %s643_s2 }
  0x56   : > { %p422_p1 = scmp.lt.s32.totalorder %s420_s6, %s416_s30 }
  0x57   : > { %p418_p10 = pnand %p417_p2, %p657_p8 }
  0x58   : > { %p423_p4 = por %p422_p1, %p421_p12 }
  0x59   : > { %p419_p11 = pneg %p418_p10 }
  0x5b   : > { %p424_p6 = pnand %p423_p4, %p419_p11 }
  0x5d   : > { %427 = shalt.err (!%p424_p6)
}
  0x5e   : > { %312 = dma.vmem_to_hbm [thread:$0]  (%p657_p8), %s602_s14, 16, %s210_s22, %s200_s23  }
  0x5f PF: > { %p329_p5 = scmp.ge.s32.totalorder %s470_s12, 2  ;;  %s224_s5 = sand.u32 1, %s458_s9  }
  0x60   : > { %p658_p7 = scmp.ne.s32.totalorder %s649_s16, 0  ;;  %s225_s7 = scalar_lea.sflag [#allocation4], %s224_s5 }
  0x62   : > { %p323_p9 = pnand %p329_p5, %p658_p7 }
  0x64   : > { %p324_p13 = pneg %p323_p9 }
  0x66   : > { %453 = dma.done.wait (%p324_p13), %s225_s7, 16  }
  0x67   : > { %455 = vsyncadd (%p324_p13), %s225_s7, 4294967280  ;;  %p16_p0 = scmp.ge.s32.totalorder %s535_s18, 5   ;;  %s659_s9 = smov %s462_s10 }
  0x68   : > { %s660_s10 = smov %s466_s11  ;;  %s661_s11 = smov %s552_s24 }
  0x69   : > { %s662_s12 = smov %s535_s18  ;;  %18 = sbr.rel (!%p16_p0) target bundleno = 6 (0x6), region = 78 }
  0x6e   :  { %229 = vsyncpa [#allocation3], 1 }
  0x6f   :  { %231 = vsyncpa [#allocation3 + $0x1], 1 }
  0x70   :  { %232 = vsyncpa [#allocation4], 1 }
  0x71   :  { %234 = vsyncpa [#allocation4 + $0x1], 1 }
  0x72   :  { %235 = vsyncpa [#allocation5], 1 }
  0x73   :  { %237 = vsyncpa [#allocation5 + $0x1], 1 }

</bundles_post_ra>
